<compile_context>
chip_gen: v5e
topology: v5e:2x2
jax: 0.10.0
libtpu: 0.0.40
codegen_flags: <defaults>
</compile_context>

<pallas_src>
import jax
import jax.numpy as jnp
from jax.experimental import pallas as pl
from jax.experimental.pallas import tpu as pltpu


# ---------------------------------------------------------------------------
# Kernel
# ---------------------------------------------------------------------------
def _mlp_kernel(x_ref,
                w1_ref, b1_ref,
                w2_ref, b2_ref,
                w3_ref, b3_ref,
                o_ref):
    """Fused 2-hidden-layer MLP forward (BN already folded into w2/b2, w3/b3).

    x:  [TB, D_in]   (f32 tile; cast to bf16 for the MXU)
    w1: [D_in, H1]   bf16, b1: [1, H1] f32
    w2: [H1,  H2]    bf16 (BN1-folded), b2: [1, H2] f32
    w3: [H2, D_out]  bf16 (BN2-folded), b3: [1, D_out] f32
    o:  [TB, D_out]  f32 (sigmoid applied, since output_size == 1)
    """
    x = x_ref[...].astype(jnp.bfloat16)

    # Layer 1: Linear -> ReLU            (BN1 folded into layer-2 weights)
    h = jnp.dot(x, w1_ref[...], preferred_element_type=jnp.float32) + b1_ref[...]
    h = jnp.maximum(h, 0.0)

    # Layer 2: Linear(BN1-folded) -> ReLU (BN2 folded into layer-3 weights)
    h = jnp.dot(h.astype(jnp.bfloat16), w2_ref[...],
                preferred_element_type=jnp.float32) + b2_ref[...]
    h = jnp.maximum(h, 0.0)

    # Output layer: Linear(BN2-folded) -> Sigmoid
    y = jnp.dot(h.astype(jnp.bfloat16), w3_ref[...],
                preferred_element_type=jnp.float32) + b3_ref[...]
    o_ref[...] = pl.reciprocal(1.0 + jnp.exp(-y), approx=False)


# ---------------------------------------------------------------------------
# Wrapper
# ---------------------------------------------------------------------------
def _round_up(x, m):
    return ((x + m - 1) // m) * m


def _vmem_limit_bytes(tb, d_in, d_out, kernel_args):
    # double-buffered activation tiles + 2x each pinned weight + headroom for intermediates
    tile_bytes = 2 * 2 * tb * (d_in + d_out) * 4
    weight_bytes = 2 * sum(int(a.size) * a.dtype.itemsize for a in kernel_args)
    scratch = 8 * tb * 128 * 4 + (2 << 20)
    total = tile_bytes + weight_bytes + scratch
    return int(min(max(total, 4 << 20), 48 << 20))   # stay well under v7x 64 MiB / TC


def fold_params_for_kernel(raw, bn_eps=1e-5):
    """Fold eval-mode BatchNorm into the following Linear layer and cast matmul weights to bf16."""
    s1 = raw["gamma1"] / jnp.sqrt(raw["var1"] + bn_eps)          # [1, H1]
    sh1 = raw["beta1"] - raw["mean1"] * s1
    s2 = raw["gamma2"] / jnp.sqrt(raw["var2"] + bn_eps)          # [1, H2]
    sh2 = raw["beta2"] - raw["mean2"] * s2

    w2f = raw["w2"] * s1.reshape(-1, 1)                           # row-scale [H1, H2]
    b2f = raw["b2"] + sh1 @ raw["w2"]                             # [1, H2]
    w3f = raw["w3"] * s2.reshape(-1, 1)                           # row-scale [H2, D_out]
    b3f = raw["b3"] + sh2 @ raw["w3"]                             # [1, D_out]

    return {
        "w1": raw["w1"].astype(jnp.bfloat16), "b1": raw["b1"].astype(jnp.float32),
        "w2": w2f.astype(jnp.bfloat16),       "b2": b2f.astype(jnp.float32),
        "w3": w3f.astype(jnp.bfloat16),       "b3": b3f.astype(jnp.float32),
    }


def mlp_forward(x, kparams, *, tile_b=256):
    """x: [B, D_in] f32. kparams: output of fold_params_for_kernel."""
    B, d_in = x.shape
    d_out = kparams["w3"].shape[1]

    # Batch tile: multiple of 8 (f32 sublane), capped by tile_b.
    tb = min(tile_b, _round_up(B, 8))
    b_pad = _round_up(B, tb)
    if b_pad != B:
        x = jnp.pad(x, ((0, b_pad - B), (0, 0)))
    grid = (b_pad // tb,)

    weight_args = (kparams["w1"], kparams["b1"],
                   kparams["w2"], kparams["b2"],
                   kparams["w3"], kparams["b3"])

    def pinned(arr):
        # Whole weight as one block, constant index map -> stays VMEM-resident across the grid.
        return pl.BlockSpec(arr.shape, lambda i: (0, 0))

    in_specs = [pl.BlockSpec((tb, d_in), lambda i: (i, 0))] + [pinned(a) for a in weight_args]
    out_spec = pl.BlockSpec((tb, d_out), lambda i: (i, 0))

    out = pl.pallas_call(
        _mlp_kernel,
        out_shape=jax.ShapeDtypeStruct((b_pad, d_out), jnp.float32),
        grid=grid,
        in_specs=in_specs,
        out_specs=out_spec,
        compiler_params=pltpu.CompilerParams(
            dimension_semantics=("parallel",),
            vmem_limit_bytes=_vmem_limit_bytes(tb, d_in, d_out, weight_args),
        ),
    )(x, *weight_args)

    return out[:B]


# ---------------------------------------------------------------------------
# Parameter init (synthetic, deterministic) + pure-JAX reference (unfolded BN)
# ---------------------------------------------------------------------------
def init_raw_params(key, input_size, hidden_sizes, output_size):
    """PyTorch-like init. Linear weights stored transposed as [in, out]; BN stats non-trivial
    so the fold is actually exercised."""
    h1, h2 = hidden_sizes
    sizes = [(input_size, h1), (h1, h2), (h2, output_size)]
    keys = jax.random.split(key, 2 * len(sizes))
    raw = {}
    for idx, (din, dout) in enumerate(sizes, start=1):
        kw, kb = keys[2 * (idx - 1)], keys[2 * (idx - 1) + 1]
        bound = 1.0 / jnp.sqrt(jnp.float32(din))
        raw[f"w{idx}"] = jax.random.uniform(kw, (din, dout), jnp.float32, -bound, bound)
        raw[f"b{idx}"] = jax.random.uniform(kb, (1, dout), jnp.float32, -bound, bound)

    for idx, h in enumerate(hidden_sizes, start=1):
        ar = jnp.arange(h, dtype=jnp.float32).reshape(1, h)
        raw[f"gamma{idx}"] = 1.0 + 0.01 * ar
        raw[f"beta{idx}"] = 0.05 - 0.002 * ar
        raw[f"mean{idx}"] = 0.01 * ar - 0.1
        raw[f"var{idx}"] = 1.0 + 0.02 * ar
    return raw


def reference_forward(x, raw, bn_eps=1e-5):
    """f32 reference matching PyTorch eval-mode semantics (explicit BN, dropout identity)."""
    def bn(a, i):
        return ((a - raw[f"mean{i}"]) / jnp.sqrt(raw[f"var{i}"] + bn_eps)
                * raw[f"gamma{i}"] + raw[f"beta{i}"])

    h = jnp.maximum(x @ raw["w1"] + raw["b1"], 0.0)
    h = bn(h, 1)
    h = jnp.maximum(h @ raw["w2"] + raw["b2"], 0.0)
    h = bn(h, 2)
    y = h @ raw["w3"] + raw["b3"]
    return jax.nn.sigmoid(y)


# ---------------------------------------------------------------------------
# Demo / self-test
# ---------------------------------------------------------------------------
if __name__ == "__main__":
    input_size = 16
    hidden_sizes = [32, 32]
    output_size = 1
    batch = 64

    key = jax.random.PRNGKey(0)
    kx, kp = jax.random.split(key)
    x = jax.random.normal(kx, (batch, input_size), jnp.float32)

    raw = init_raw_params(kp, input_size, hidden_sizes, output_size)
    kparams = fold_params_for_kernel(raw)

    # tile_b=16 at these toy sizes just to exercise the batch grid / pipeline (grid=(4,)).
    out = mlp_forward(x, kparams, tile_b=16)
    out = jax.block_until_ready(out)

    ref = reference_forward(x, raw)
    assert out.shape == (batch, output_size)
    # bf16 matmul operands vs f32 reference -> loose-but-meaningful tolerance on sigmoid output.
    assert jnp.allclose(out, ref, atol=2e-2, rtol=0.0), "mismatch vs reference"

    print("KERNEL_OK")
</pallas_src>

<mosaic_0001>
module attributes {stable_mosaic.version = 11 : i64} {
  func.func @_mlp_kernel(%arg0: i32, %arg1: memref<16x16xf32, #tpu.memory_space<vmem>>, %arg2: memref<16x32xbf16, #tpu.memory_space<vmem>>, %arg3: memref<1x32xf32, #tpu.memory_space<vmem>>, %arg4: memref<32x32xbf16, #tpu.memory_space<vmem>>, %arg5: memref<1x32xf32, #tpu.memory_space<vmem>>, %arg6: memref<32x1xbf16, #tpu.memory_space<vmem>>, %arg7: memref<1x1xf32, #tpu.memory_space<vmem>>, %arg8: memref<16x1xf32, #tpu.memory_space<vmem>>) attributes {dimension_semantics = [#tpu.dimension_semantics<parallel>], iteration_bounds = array<i64: 4>, scalar_prefetch = 0 : i64, scratch_operands = 0 : i64, tpu.core_type = #tpu.core_type<tc>, window_params = [{transform_indices = @transform_0, window_bounds = array<i64: 16, 16>}, {pipeline_mode = #tpu.pipeline_mode<synchronous>, transform_indices = @transform_1, window_bounds = array<i64: 16, 32>}, {pipeline_mode = #tpu.pipeline_mode<synchronous>, transform_indices = @transform_2, window_bounds = array<i64: 1, 32>}, {pipeline_mode = #tpu.pipeline_mode<synchronous>, transform_indices = @transform_3, window_bounds = array<i64: 32, 32>}, {pipeline_mode = #tpu.pipeline_mode<synchronous>, transform_indices = @transform_4, window_bounds = array<i64: 1, 32>}, {pipeline_mode = #tpu.pipeline_mode<synchronous>, transform_indices = @transform_5, window_bounds = array<i64: 32, 1>}, {pipeline_mode = #tpu.pipeline_mode<synchronous>, transform_indices = @transform_6, window_bounds = array<i64: 1, 1>}, {transform_indices = @transform_7, window_bounds = array<i64: 16, 1>}]} {
    %c0 = arith.constant 0 : index
    %c0_0 = arith.constant 0 : index
    %0 = vector.load %arg1[%c0, %c0_0] : memref<16x16xf32, #tpu.memory_space<vmem>>, vector<16x16xf32>
    %1 = arith.truncf %0 : vector<16x16xf32> to vector<16x16xbf16>
    %c0_1 = arith.constant 0 : index
    %c0_2 = arith.constant 0 : index
    %2 = vector.load %arg2[%c0_1, %c0_2] : memref<16x32xbf16, #tpu.memory_space<vmem>>, vector<16x32xbf16>
    %cst = arith.constant dense<0.000000e+00> : vector<16x32xf32>
    %3 = tpu.matmul %1, %2, %cst {dimension_numbers = #tpu.dot_dimension_numbers<[1], [0], [0], [1], [0, 0, 1, 1], [], []>} : vector<16x16xbf16>, vector<16x32xbf16>, vector<16x32xf32> -> vector<16x32xf32>
    %c0_3 = arith.constant 0 : index
    %c0_4 = arith.constant 0 : index
    %4 = vector.load %arg3[%c0_3, %c0_4] : memref<1x32xf32, #tpu.memory_space<vmem>>, vector<1x32xf32>
    %5 = vector.broadcast %4 : vector<1x32xf32> to vector<16x32xf32>
    %6 = arith.addf %3, %5 : vector<16x32xf32>
    %cst_5 = arith.constant 0.000000e+00 : f32
    %7 = vector.broadcast %cst_5 : f32 to vector<16x32xf32>
    %8 = arith.maximumf %6, %7 : vector<16x32xf32>
    %9 = arith.truncf %8 : vector<16x32xf32> to vector<16x32xbf16>
    %c0_6 = arith.constant 0 : index
    %c0_7 = arith.constant 0 : index
    %10 = vector.load %arg4[%c0_6, %c0_7] : memref<32x32xbf16, #tpu.memory_space<vmem>>, vector<32x32xbf16>
    %cst_8 = arith.constant dense<0.000000e+00> : vector<16x32xf32>
    %11 = tpu.matmul %9, %10, %cst_8 {dimension_numbers = #tpu.dot_dimension_numbers<[1], [0], [0], [1], [0, 0, 1, 1], [], []>} : vector<16x32xbf16>, vector<32x32xbf16>, vector<16x32xf32> -> vector<16x32xf32>
    %c0_9 = arith.constant 0 : index
    %c0_10 = arith.constant 0 : index
    %12 = vector.load %arg5[%c0_9, %c0_10] : memref<1x32xf32, #tpu.memory_space<vmem>>, vector<1x32xf32>
    %13 = vector.broadcast %12 : vector<1x32xf32> to vector<16x32xf32>
    %14 = arith.addf %11, %13 : vector<16x32xf32>
    %cst_11 = arith.constant 0.000000e+00 : f32
    %15 = vector.broadcast %cst_11 : f32 to vector<16x32xf32>
    %16 = arith.maximumf %14, %15 : vector<16x32xf32>
    %17 = arith.truncf %16 : vector<16x32xf32> to vector<16x32xbf16>
    %c0_12 = arith.constant 0 : index
    %c0_13 = arith.constant 0 : index
    %18 = vector.load %arg6[%c0_12, %c0_13] : memref<32x1xbf16, #tpu.memory_space<vmem>>, vector<32x1xbf16>
    %cst_14 = arith.constant dense<0.000000e+00> : vector<16x1xf32>
    %19 = tpu.matmul %17, %18, %cst_14 {dimension_numbers = #tpu.dot_dimension_numbers<[1], [0], [0], [1], [0, 0, 1, 1], [], []>} : vector<16x32xbf16>, vector<32x1xbf16>, vector<16x1xf32> -> vector<16x1xf32>
    %c0_15 = arith.constant 0 : index
    %c0_16 = arith.constant 0 : index
    %20 = vector.load %arg7[%c0_15, %c0_16] : memref<1x1xf32, #tpu.memory_space<vmem>>, vector<1x1xf32>
    %21 = vector.broadcast %20 : vector<1x1xf32> to vector<16x1xf32>
    %22 = arith.addf %19, %21 : vector<16x1xf32>
    %cst_17 = arith.constant 0.000000e+00 : f32
    %23 = vector.broadcast %cst_17 : f32 to vector<16x1xf32>
    %24 = arith.subf %23, %22 : vector<16x1xf32>
    %25 = math.exp %24 : vector<16x1xf32>
    %cst_18 = arith.constant 1.000000e+00 : f32
    %26 = vector.broadcast %cst_18 : f32 to vector<16x1xf32>
    %27 = arith.addf %26, %25 : vector<16x1xf32>
    %28 = tpu.reciprocal %27 : vector<16x1xf32> -> vector<16x1xf32>
    %c0_19 = arith.constant 0 : index
    %c0_20 = arith.constant 0 : index
    %29 = vector.load %arg8[%c0_19, %c0_20] : memref<16x1xf32, #tpu.memory_space<vmem>>, vector<16x1xf32>
    tpu.vector_store %arg8[%c0_19, %c0_20], %28 {strides = array<i32>} : memref<16x1xf32, #tpu.memory_space<vmem>>, vector<16x1xf32>,
    return
  }
  func.func @transform_0(%arg0: i32) -> (i32, i32) {
    %c0_i32 = arith.constant 0 : i32
    %c0_i32_0 = arith.constant 0 : i32
    return %arg0, %c0_i32 : i32, i32
  }
  func.func @transform_1(%arg0: i32) -> (i32, i32) {
    %c0_i32 = arith.constant 0 : i32
    %c0_i32_0 = arith.constant 0 : i32
    %c0_i32_1 = arith.constant 0 : i32
    return %c0_i32, %c0_i32_0 : i32, i32
  }
  func.func @transform_2(%arg0: i32) -> (i32, i32) {
    %c0_i32 = arith.constant 0 : i32
    %c0_i32_0 = arith.constant 0 : i32
    %c0_i32_1 = arith.constant 0 : i32
    return %c0_i32, %c0_i32_0 : i32, i32
  }
  func.func @transform_3(%arg0: i32) -> (i32, i32) {
    %c0_i32 = arith.constant 0 : i32
    %c0_i32_0 = arith.constant 0 : i32
    %c0_i32_1 = arith.constant 0 : i32
    return %c0_i32, %c0_i32_0 : i32, i32
  }
  func.func @transform_4(%arg0: i32) -> (i32, i32) {
    %c0_i32 = arith.constant 0 : i32
    %c0_i32_0 = arith.constant 0 : i32
    %c0_i32_1 = arith.constant 0 : i32
    return %c0_i32, %c0_i32_0 : i32, i32
  }
  func.func @transform_5(%arg0: i32) -> (i32, i32) {
    %c0_i32 = arith.constant 0 : i32
    %c0_i32_0 = arith.constant 0 : i32
    %c0_i32_1 = arith.constant 0 : i32
    return %c0_i32, %c0_i32_0 : i32, i32
  }
  func.func @transform_6(%arg0: i32) -> (i32, i32) {
    %c0_i32 = arith.constant 0 : i32
    %c0_i32_0 = arith.constant 0 : i32
    %c0_i32_1 = arith.constant 0 : i32
    return %c0_i32, %c0_i32_0 : i32, i32
  }
  func.func @transform_7(%arg0: i32) -> (i32, i32) {
    %c0_i32 = arith.constant 0 : i32
    %c0_i32_0 = arith.constant 0 : i32
    return %arg0, %c0_i32 : i32, i32
  }
}

</mosaic_0001>

<bundles_post_ra>
// kernel: tpu_custom_call.1
= control target key start
LH: loop header
LB: loop body
LE: loop exit
PB: predicated region body
PF: predicated region fallthrough
CT: control target
= control target key end

     0   :  { %s603_s26 = smov 0   ;;  %s650_s0 = inlined_call_operand.vmem [shape: f32[64,16], index: 0, kind: input, shape index: {}]   ;;  %s651_s1 = inlined_call_operand.vmem [shape: bf16[16,32], index: 1, kind: input, shape index: {}]   ;;  %s652_s2 = inlined_call_operand.vmem [shape: f32[1,32], index: 2, kind: input, shape index: {}]   ;;  %s653_s3 = inlined_call_operand.vmem [shape: bf16[32,32], index: 3, kind: input, shape index: {}]   ;;  %s654_s4 = inlined_call_operand.vmem [shape: f32[1,32], index: 4, kind: input, shape index: {}]   ;;  %s655_s5 = inlined_call_operand.vmem [shape: bf16[32,1], index: 5, kind: input, shape index: {}]   ;;  %s656_s6 = inlined_call_operand.<no memory space> [shape: f32[1,1], index: 6, kind: input, shape index: {}]   ;;  %s657_s7 = inlined_call_operand.vmem [shape: f32[64,1], index: 7, kind: output, shape index: {}]  }
   0x1   :  { %v12_v0 = vstv %s656_s6 }
   0x2   :  { %13 = vst [vmem:[#allocation2] sm:$0x1] %v12_v0 }
   0x3 LB: > { %s494_s27 = sadd.s32 4294967295, %s558_s26   ;;  %p498_p0 = scmp.ge.s32.totalorder %s558_s26, 1  ;;  %s558_s26 = sphi %s603_s26, %s19_s26  }
   0x4   : > { %p240_p1 = scmp.lt.s32.totalorder %s558_s26, 5 }
   0x6   : > { %p241_p2 = pnand %p498_p0, %p240_p1 }
   0x7   : > { %s499_s6 = sshll.u32 (!%p241_p2), %s494_s27, 1 }
   0x8   : > { %244 = sbr.rel (%p241_p2) target bundleno = 472 (0x1d8), region = 48  ;;  %p273_p3 = scmp.lt.s32.totalorder (!%p241_p2), %s499_s6, 7 }
   0xd   : > { %v528_v1 = vld [vmem:[%s651_s1] sm:$0xff]  ;;  %s659_s6 = smov (!%p273_p3, %s499_s6), 7  ;;  %vm300_vm0 = vcmask 130048   ;;  %v530_v5 = vld [vmem:[%s653_s3 + $0x8] sm:$0xff]  ;;  %vm341_vm1 = vcmask 261120   ;;  %vm435_vm5 = vcmask 7168  }
   0xe   : > { %311 = vmatpush.bf16.msra.mxu0 %v528_v1  ;;  %s500_s30 = sshll.u32 %s659_s6, 3  ;;  %351 = vmatpush.bf16.msra.mxu1 %v530_v5  ;;  %v529_v6 = vld [vmem:[%s653_s3] sm:$0xff]  ;;  %v532_v15 = vld [vmem:[%s655_s5 + $0x8] sm:$0xff] }
   0xf   : > { %s276_s10 = scalar_lea.vmem %s650_s0, %s500_s30  ;;  %v541_v8 = vld [vmem:[%s652_s2] ss:$0 sm:$0xff]  ;;  %391 = vmatpush.bf16.msra.mxu2 %v532_v15  ;;  %s282_s25 = scalar_lea.vmem %s657_s7, %s500_s30 }
  0x10   : > { %v285_v2 = vld [vmem:[%s276_s10] sm:$0xff]  ;;  %v286_v3 = vld [vmem:[%s276_s10 + $0x8] sm:$0xff] }
  0x11   : > { %v287_v4 = vpack.c.bf16 %v286_v3, %v285_v2  ;;  %v531_v16 = vld [vmem:[%s655_s5] sm:$0xff] }
  0x12   : > { %352 = vmatpush.bf16.msra.mxu1 %v529_v6  ;;  %v542_v18 = vld [vmem:[%s654_s4] ss:$0 sm:$0xff] }
  0x13   : > { %507 = vmatmul.msk.bf16.vlgmr.msra.gmra.mxu0 %vm300_vm0, %v287_v4  ;;  %392 = vmatpush.bf16.msra.mxu2 %v531_v16  ;;  %v543_v25 = vld [vmem:[#allocation2] ss:$0 sm:$0xff] }
  0x90   : > { %v313_v7 = vpop.f32.mrf.mxu0 }
  0x91   : > { %v314_v9 = vadd.f32 %v541_v8, %v313_v7 }
  0x93   : > { %v318_v12 = vmax.f32 %v314_v9, 0.0 }
  0x98   : > { %v315_v10 = vpop.f32.mrf.mxu0 }
  0x99   : > { %v316_v11 = vadd.f32 %v541_v8, %v315_v10 }
  0x9b   : > { %v319_v13 = vmax.f32 %v316_v11, 0.0 }
  0x9d   : > { %v320_v14 = vpack.c.bf16 %v319_v13, %v318_v12 }
  0x9f   : > { %516 = vmatmul.msk.bf16.vlgmr.msra.gmra.mxu1 %vm341_vm1, %v320_v14 }
 0x11c   : > { %v354_v17 = vpop.f32.mrf.mxu1 }
 0x11d   : > { %v355_v19 = vadd.f32 %v542_v18, %v354_v17 }
 0x11f   : > { %v359_v22 = vmax.f32 %v355_v19, 0.0 }
 0x124   : > { %v356_v20 = vpop.f32.mrf.mxu1 }
 0x125   : > { %v357_v21 = vadd.f32 %v542_v18, %v356_v20 }
 0x127   : > { %v360_v23 = vmax.f32 %v357_v21, 0.0 }
 0x129   : > { %v361_v24 = vpack.c.bf16 %v360_v23, %v359_v22 }
 0x12b   : > { %525 = vmatmul.msk.bf16.vlgmr.msra.gmra.mxu2 %vm341_vm1, %v361_v24 }
 0x1ae   : > { %v394_v26 = vpop.f32.mrf.mxu2 }
 0x1af   : > { %v395_v27 = vadd.f32 %v543_v25, %v394_v26 }
 0x1b1   : > { %v399_v28 = vsub.f32 0.0, %v395_v27 }
 0x1b3   : > { %v401_v29 = vmul.f32 1.442695, %v399_v28 }
 0x1b5   : > { %544 = vpow2.f32 %v401_v29 }
 0x1b6   : > { %v396_v30 = vpop.f32.mrf.mxu2 }
 0x1b7   : > { %v397_v31 = vadd.f32 %v543_v25, %v396_v30 }
 0x1b9   : > { %v400_v32 = vsub.f32 0.0, %v397_v31 }
 0x1bb   : > { %v545_v33 = vpop.eup %544  ;;  %v403_v34 = vmul.f32 1.442695, %v400_v32 }
 0x1bc   : > { %v405_v35 = vadd.f32 1.0, %v545_v33 }
 0x1bd   : > { %546 = vpow2.f32 %v403_v34 }
 0x1be   : > { %548 = vrcp.f32 %v405_v35  ;;  %v418_v41 = vand.u32 2147483648, %v405_v35  ;;  %v416_v43 = vand.u32 2147483647, %v405_v35  ;;  %vm412_vm3 = vweird.f32 %v405_v35 }
 0x1c0   : > { %v419_v46 = vor.u32 1.1754944e-38, %v418_v41  ;;  %vm417_vm6 = vcmp.eq.f32.partialorder %v416_v43, 8.507059e+37 }
 0x1c3   : > { %v547_v36 = vpop.eup %546 }
 0x1c4   : > { %v549_v37 = vpop.eup %548  ;;  %v406_v38 = vadd.f32 1.0, %v547_v36 }
 0x1c5   : > { %v408_v39 = vmul.f32 %v549_v37, %v405_v35  ;;  %vm413_vm2 = vweird.f32 %v549_v37 }
 0x1c6   : > { %550 = vrcp.f32 %v406_v38  ;;  %vm414_vm4 = vmor %vm412_vm3, %vm413_vm2  ;;  %v432_v51 = vand.u32 2147483648, %v406_v38  ;;  %v430_v53 = vand.u32 2147483647, %v406_v38  ;;  %vm426_vm8 = vweird.f32 %v406_v38 }
 0x1c7   : > { %v409_v40 = vsub.f32 1.0, %v408_v39 }
 0x1c8   : > { %v433_v55 = vor.u32 1.1754944e-38, %v432_v51  ;;  %vm431_vm10 = vcmp.eq.f32.partialorder %v430_v53, 8.507059e+37 }
 0x1c9   : > { %v410_v42 = vmul.f32 %v549_v37, %v409_v40 }
 0x1cb   : > { %v411_v44 = vadd.f32 %v549_v37, %v410_v42 }
 0x1cc   : > { %v551_v45 = vpop.eup %550 }
 0x1cd   : > { %v415_v47 = vsel %vm414_vm4, %v549_v37, %v411_v44  ;;  %v422_v48 = vmul.f32 %v551_v45, %v406_v38  ;;  %vm427_vm7 = vweird.f32 %v551_v45 }
 0x1ce   : > { %v420_v49 = vsel %vm417_vm6, %v419_v46, %v415_v47  ;;  %vm428_vm9 = vmor %vm426_vm8, %vm427_vm7 }
 0x1cf   : > { %436 = vst.msk [vmem:[%s282_s25] sm:$0xff] %vm435_vm5, %v420_v49  ;;  %v423_v50 = vsub.f32 1.0, %v422_v48 }
 0x1d1   : > { %v424_v52 = vmul.f32 %v551_v45, %v423_v50 }
 0x1d3   : > { %v425_v54 = vadd.f32 %v551_v45, %v424_v52 }
 0x1d5   : > { %v429_v56 = vsel %vm428_vm9, %v551_v45, %v425_v54 }
 0x1d6   : > { %v434_v57 = vsel %vm431_vm10, %v433_v55, %v429_v56 }
 0x1d7   : > { %437 = vst.msk [vmem:[%s282_s25 + $0x8] sm:$0xff] %vm435_vm5, %v434_v57 }
 0x1d8 PF: > { %s19_s26 = sadd.s32 1, %s558_s26  }
 0x1d9   : > { %p16_p4 = scmp.ge.s32.totalorder %s19_s26, 6  }
 0x1db   :  { %18 = sbr.rel (!%p16_p4) target bundleno = 3 (0x3), region = 78 }

</bundles_post_ra>
